<compile_context>
chip_gen: v7x
topology: tpu7x:2x2x1
jax: 0.10.0
libtpu: 0.0.40
codegen_flags: <defaults>
</compile_context>

<pallas_src>
import jax
import jax.numpy as jnp
import numpy as np
from jax.experimental import pallas as pl
from jax.experimental.pallas import tpu as pltpu

NEG_SLOPE = 0.1  # torch.nn.LeakyReLU(negative_slope=0.1)


def _causal_planar_kernel(u_ref, wfull_ref, vhat_ref, scal_ref, x_ref, logd_ref):
    # u_ref    : [TB, D]  full feature rows (VMEM, streamed over the batch grid)
    # wfull_ref: [1, D]   w scattered onto the full feature axis (zero off-node)
    # vhat_ref : [1, D]   v_hat scattered onto the full feature axis (zero off-node)
    # scal_ref : [2]      SMEM scalars: [bias b, c = sum(w * v_hat)]
    # x_ref    : [TB, D]  output rows (HBM-aliased with u)
    # logd_ref : [TB, 1]  -log|1 + a*c| per row
    u = u_ref[...]
    wf = wfull_ref[...]
    vh = vhat_ref[...]
    bias = scal_ref[0]
    c = scal_ref[1]

    # lin = sum_j w[j] * u[:, nodes[j]] + b  (w_full is zero off-node, so the
    # dense lane reduction equals the gathered sum).
    lin = jnp.sum(u * wf, axis=1, keepdims=True) + bias          # [TB, 1]

    # LeakyReLU-derivative factor: 1.0 where lin >= 0, 0.1 where lin < 0.
    a = jnp.where(lin < 0, NEG_SLOPE, 1.0)                       # [TB, 1]

    # inner_ = sum(w * (a * v_hat), axis=1) = a * c  (a is per-row scalar).
    denom = 1.0 + a * c                                          # [TB, 1]
    inv_denom = pl.reciprocal(denom, approx=False)               # EUP, not VPU div
    scale = a * lin * inv_denom                                  # [TB, 1]

    # x[:, nodes] = u[:, nodes] - (a*v_hat)*lin/(1+inner_);  x elsewhere = u.
    # vhat_full is zero off-node, so one dense row update implements the scatter.
    x_ref[...] = u - scale * vh                                  # [TB, D]
    logd_ref[...] = -jnp.log(jnp.abs(denom))                     # [TB, 1]


def causal_planar_forward(u, w, v, b, nodes, *, block_b=128):
    """Fused CausalPlanarLayer.forward.

    u: [B, D] float32 (its buffer is aliased into the x output);
    w, v: [dim] float32; b: [1] float32; nodes: static python indices.
    Returns (x [B, D], logd [B]).
    """
    nodes = tuple(int(n) for n in nodes)
    B, D = u.shape
    idx = jnp.asarray(nodes, dtype=jnp.int32)

    u = u.astype(jnp.float32)
    w = w.astype(jnp.float32)
    v = v.astype(jnp.float32)

    # ---- parameter-only math hoisted out of the kernel (O(dim), runs once) ----
    inner = jnp.sum(w * v)
    # softplus == log(1 + exp(inner)) but overflow-safe for large inner.
    v_hat = v + (jax.nn.softplus(inner) - 1.0 - inner) * w / jnp.sum(w * w)
    c = jnp.sum(w * v_hat)                                  # inner_ = a * c

    w_full = jnp.zeros((D,), jnp.float32).at[idx].set(w).reshape(1, D)
    vhat_full = jnp.zeros((D,), jnp.float32).at[idx].set(v_hat).reshape(1, D)
    scalars = jnp.stack([b.reshape(()).astype(jnp.float32), c])  # [2] -> SMEM

    # ---- batch tiling: largest candidate tile (multiple of 8) dividing B ----
    tb = B
    for cand in (block_b, block_b // 2, block_b // 4, block_b // 8):
        if cand >= 8 and cand % 8 == 0 and cand <= B and B % cand == 0:
            tb = cand
            break
    grid = (B // tb,)

    x, logd2 = pl.pallas_call(
        _causal_planar_kernel,
        out_shape=(
            jax.ShapeDtypeStruct((B, D), jnp.float32),
            jax.ShapeDtypeStruct((B, 1), jnp.float32),
        ),
        grid=grid,
        in_specs=[
            pl.BlockSpec((tb, D), lambda i: (i, 0)),              # u: streamed over B
            pl.BlockSpec((1, D), lambda i: (0, 0)),               # w_full: resident
            pl.BlockSpec((1, D), lambda i: (0, 0)),               # vhat_full: resident
            pl.BlockSpec(memory_space=pltpu.MemorySpace.SMEM),    # [b, c] scalars
        ],
        out_specs=(
            pl.BlockSpec((tb, D), lambda i: (i, 0)),              # x (aliased with u)
            pl.BlockSpec((tb, 1), lambda i: (i, 0)),              # logd column
        ),
        input_output_aliases={0: 0},  # update u's HBM buffer in place -> x
        compiler_params=pltpu.CompilerParams(
            dimension_semantics=("parallel",),  # megacore split on v7x; no-op on v5e/v6e
        ),
    )(u, w_full, vhat_full, scalars)

    return x, logd2[:, 0]


def _reference_forward(u, w, v, b, nodes):
    """Pure-JAX reference mirroring the PyTorch forward, for validation."""
    nodes = jnp.asarray(tuple(int(n) for n in nodes))
    u_sel = u[:, nodes]
    lin = jnp.sum(w * u_sel, axis=1, keepdims=True) + b
    a = (lin < 0).astype(u.dtype) * (NEG_SLOPE - 1.0) + 1.0
    inner = jnp.sum(w * v)
    v_hat = v + (jnp.log(1.0 + jnp.exp(inner)) - 1.0 - inner) * w / jnp.sum(w ** 2)
    vb = a * v_hat
    inner_ = jnp.sum(w * vb, axis=1, keepdims=True)
    x = u.at[:, nodes].set(u_sel - vb * (lin / (1.0 + inner_)))
    logd = -jnp.log(jnp.abs(1.0 + inner_))[:, 0]
    return x, logd


if __name__ == "__main__":
    key = jax.random.PRNGKey(0)
    B, D = 256, 16
    nodes = (1, 3, 5, 7, 9, 11)  # self.nodes; dim = len(nodes) = 6
    dim = len(nodes)

    k1, k2, k3, k4 = jax.random.split(key, 4)
    u = jax.random.normal(k1, (B, D), dtype=jnp.float32)
    # Deterministic parameter init matching __init__: normal(0, 0.1) / normal(0, 0.01)
    w = 0.1 * jax.random.normal(k2, (dim,), dtype=jnp.float32)
    v = 0.1 * jax.random.normal(k3, (dim,), dtype=jnp.float32)
    b = 0.01 * jax.random.normal(k4, (1,), dtype=jnp.float32)

    # Reference first: the kernel aliases/donates u's buffer into x.
    x_ref, logd_ref = _reference_forward(u, w, v, b, nodes)
    jax.block_until_ready((x_ref, logd_ref))

    x, logd = causal_planar_forward(u, w, v, b, nodes, block_b=128)
    jax.block_until_ready((x, logd))

    np.testing.assert_allclose(np.asarray(x), np.asarray(x_ref), rtol=1e-5, atol=1e-5)
    np.testing.assert_allclose(np.asarray(logd), np.asarray(logd_ref), rtol=1e-5, atol=1e-5)

    print("KERNEL_OK")
</pallas_src>

<mosaic_0001>
module attributes {stable_mosaic.version = 11 : i64} {
  func.func @_causal_planar_kernel(%arg0: i32, %arg1: memref<128x16xf32, #tpu.memory_space<vmem>>, %arg2: memref<1x16xf32, #tpu.memory_space<vmem>>, %arg3: memref<1x16xf32, #tpu.memory_space<vmem>>, %arg4: memref<2xf32, #tpu.memory_space<smem>>, %arg5: memref<128x16xf32, #tpu.memory_space<vmem>>, %arg6: memref<128x1xf32, #tpu.memory_space<vmem>>) attributes {dimension_semantics = [#tpu.dimension_semantics<parallel>], iteration_bounds = array<i64: 2>, scalar_prefetch = 0 : i64, scratch_operands = 0 : i64, tpu.core_type = #tpu.core_type<tc>, window_params = [{transform_indices = @transform_0, window_bounds = array<i64: 128, 16>}, {pipeline_mode = #tpu.pipeline_mode<synchronous>, transform_indices = @transform_1, window_bounds = array<i64: 1, 16>}, {pipeline_mode = #tpu.pipeline_mode<synchronous>, transform_indices = @transform_2, window_bounds = array<i64: 1, 16>}, {transform_indices = @transform_3, window_bounds = array<i64: 2>}, {transform_indices = @transform_4, window_bounds = array<i64: 128, 16>}, {transform_indices = @transform_5, window_bounds = array<i64: 128, 1>}]} {
    %c0 = arith.constant 0 : index
    %c0_0 = arith.constant 0 : index
    %0 = vector.load %arg1[%c0, %c0_0] : memref<128x16xf32, #tpu.memory_space<vmem>>, vector<128x16xf32>
    %c0_1 = arith.constant 0 : index
    %c0_2 = arith.constant 0 : index
    %1 = vector.load %arg2[%c0_1, %c0_2] : memref<1x16xf32, #tpu.memory_space<vmem>>, vector<1x16xf32>
    %c0_3 = arith.constant 0 : index
    %c0_4 = arith.constant 0 : index
    %2 = vector.load %arg3[%c0_3, %c0_4] : memref<1x16xf32, #tpu.memory_space<vmem>>, vector<1x16xf32>
    %c0_5 = arith.constant 0 : index
    %3 = memref.load %arg4[%c0_5] : memref<2xf32, #tpu.memory_space<smem>>
    %c1 = arith.constant 1 : index
    %4 = memref.load %arg4[%c1] : memref<2xf32, #tpu.memory_space<smem>>
    %5 = vector.broadcast %1 : vector<1x16xf32> to vector<128x16xf32>
    %6 = arith.mulf %0, %5 : vector<128x16xf32>
    %cst = arith.constant dense<0.000000e+00> : vector<128xf32>
    %7 = vector.multi_reduction <add>, %6, %cst [1] : vector<128x16xf32> to vector<128xf32>
    %8 = vector.shape_cast %7 : vector<128xf32> to vector<128x1xf32>
    %9 = vector.broadcast %3 : f32 to vector<128x1xf32>
    %10 = arith.addf %8, %9 : vector<128x1xf32>
    %cst_6 = arith.constant 0.000000e+00 : f32
    %11 = vector.broadcast %cst_6 : f32 to vector<128x1xf32>
    %12 = arith.cmpf olt, %10, %11 : vector<128x1xf32>
    %cst_7 = arith.constant 1.000000e-01 : f32
    %cst_8 = arith.constant 1.000000e+00 : f32
    %13 = vector.broadcast %cst_7 : f32 to vector<128x1xf32>
    %14 = vector.broadcast %cst_8 : f32 to vector<128x1xf32>
    %15 = arith.select %12, %13, %14 : vector<128x1xi1>, vector<128x1xf32>
    %16 = vector.broadcast %4 : f32 to vector<128x1xf32>
    %17 = arith.mulf %15, %16 : vector<128x1xf32>
    %cst_9 = arith.constant 1.000000e+00 : f32
    %18 = vector.broadcast %cst_9 : f32 to vector<128x1xf32>
    %19 = arith.addf %18, %17 : vector<128x1xf32>
    %20 = tpu.reciprocal %19 : vector<128x1xf32> -> vector<128x1xf32>
    %21 = arith.mulf %15, %10 : vector<128x1xf32>
    %22 = arith.mulf %21, %20 : vector<128x1xf32>
    %23 = vector.broadcast %22 : vector<128x1xf32> to vector<128x16xf32>
    %24 = vector.broadcast %2 : vector<1x16xf32> to vector<128x16xf32>
    %25 = arith.mulf %23, %24 : vector<128x16xf32>
    %26 = arith.subf %0, %25 : vector<128x16xf32>
    %c0_10 = arith.constant 0 : index
    %c0_11 = arith.constant 0 : index
    %27 = vector.load %arg5[%c0_10, %c0_11] : memref<128x16xf32, #tpu.memory_space<vmem>>, vector<128x16xf32>
    tpu.vector_store %arg5[%c0_10, %c0_11], %26 {strides = array<i32>} : memref<128x16xf32, #tpu.memory_space<vmem>>, vector<128x16xf32>,
    %28 = math.absf %19 : vector<128x1xf32>
    %29 = math.log %28 : vector<128x1xf32>
    %cst_12 = arith.constant 0.000000e+00 : f32
    %30 = vector.broadcast %cst_12 : f32 to vector<128x1xf32>
    %31 = arith.subf %30, %29 : vector<128x1xf32>
    %c0_13 = arith.constant 0 : index
    %c0_14 = arith.constant 0 : index
    %32 = vector.load %arg6[%c0_13, %c0_14] : memref<128x1xf32, #tpu.memory_space<vmem>>, vector<128x1xf32>
    tpu.vector_store %arg6[%c0_13, %c0_14], %31 {strides = array<i32>} : memref<128x1xf32, #tpu.memory_space<vmem>>, vector<128x1xf32>,
    return
  }
  func.func @transform_0(%arg0: i32) -> (i32, i32) {
    %c0_i32 = arith.constant 0 : i32
    %c0_i32_0 = arith.constant 0 : i32
    return %arg0, %c0_i32 : i32, i32
  }
  func.func @transform_1(%arg0: i32) -> (i32, i32) {
    %c0_i32 = arith.constant 0 : i32
    %c0_i32_0 = arith.constant 0 : i32
    %c0_i32_1 = arith.constant 0 : i32
    return %c0_i32, %c0_i32_0 : i32, i32
  }
  func.func @transform_2(%arg0: i32) -> (i32, i32) {
    %c0_i32 = arith.constant 0 : i32
    %c0_i32_0 = arith.constant 0 : i32
    %c0_i32_1 = arith.constant 0 : i32
    return %c0_i32, %c0_i32_0 : i32, i32
  }
  func.func @transform_3(%arg0: i32) -> i32 {
    %c0_i32 = arith.constant 0 : i32
    %c0_i32_0 = arith.constant 0 : i32
    return %c0_i32 : i32
  }
  func.func @transform_4(%arg0: i32) -> (i32, i32) {
    %c0_i32 = arith.constant 0 : i32
    %c0_i32_0 = arith.constant 0 : i32
    return %arg0, %c0_i32 : i32, i32
  }
  func.func @transform_5(%arg0: i32) -> (i32, i32) {
    %c0_i32 = arith.constant 0 : i32
    %c0_i32_0 = arith.constant 0 : i32
    return %arg0, %c0_i32 : i32, i32
  }
}

</mosaic_0001>

<bundles_post_ra>
// kernel: tpu_custom_call.1
= control target key start
LH: loop header
LB: loop body
LE: loop exit
PB: predicated region body
PF: predicated region fallthrough
CT: control target
= control target key end

     0   :  { %11 = vsyncpa [#allocation3], 0  ;;  %s875_s18 = smov 0   ;;  %s1233_s0 = inlined_call_operand.vmem [shape: f32[256,16], index: 0, kind: input, shape index: {}, may-alias: {0,4}]   ;;  %s1234_s1 = inlined_call_operand.vmem [shape: f32[1,16], index: 1, kind: input, shape index: {}]   ;;  %s1235_s2 = inlined_call_operand.vmem [shape: f32[1,16], index: 2, kind: input, shape index: {}]   ;;  %s1236_s3 = inlined_call_operand.vmem [shape: f32[2], index: 3, kind: input, shape index: {}]   ;;  %s1237_s4 = inlined_call_operand.vmem [shape: f32[256,16], index: 4, kind: output, shape index: {0}, may-alias: {0,4}]   ;;  %s1238_s5 = inlined_call_operand.vmem [shape: f32[256,1], index: 5, kind: output, shape index: {1}]  }
   0x1 LB: > { %s714_s19 = sadd.s32 4294967295, %s841_s18   ;;  %p716_p0 = scmp.ge.s32.totalorder %s841_s18, 1  ;;  %s841_s18 = sphi %s875_s18, %s17_s18  }
   0x2   : > { %p163_p1 = scmp.lt.s32.totalorder %s841_s18, 3  ;;  %s182_s22 = sshll.u32 %s1236_s3, 4  ;;  %s183_s22 = int_to_ptr.vmem [resolvable:$true] %s182_s22 }
   0x3   : > { %p890_p3 = scmp.eq.s32.totalorder %s714_s19, 0  ;;  %s816_s25 = scalar_lea.vmem %s183_s22, 16 }
   0x4   : > { %p886_p2 = pnand %p716_p0, %p163_p1  ;;  %p817_p6 = scmp.ne.s32.totalorder %s183_s22, %s816_s25 }
   0x5   : > { %p824_p10 = scmp.lt.s32.totalorder %s183_s22, %s183_s22  ;;  %p825_p11 = scmp.lt.s32.totalorder %s816_s25, %s816_s25 }
   0x6   : > { %p736_p4 = pneg %p886_p2 }
   0x7   : > { %p826_p12 = por %p825_p11, %p824_p10 }
   0x8   : > { %p737_p5 = pnand %p890_p3, %p736_p4 }
   0xa   : > { %p818_p7 = pneg %p737_p5 }
   0xc   : > { %p819_p8 = pnand %p818_p7, %p817_p6 }
   0xe   : > { %p820_p9 = pneg %p819_p8 }
  0x10   : > { %p827_p13 = pnand %p826_p12, %p820_p9 }
  0x12   : > { %830 = shalt.err (!%p827_p13)
}
  0x13   : > { %s843_s26 = smov [#allocation2]   ;;  %204 = sbr.rel (%p886_p2) target bundleno = 252 (0xfc), region = 36 }
  0x14   : > { %739 = dma.vmem_to_smem (!%p737_p5), %s183_s22, 16, %s843_s26, [#allocation3]  }
  0x1a   : > { %836 = dma.done.wait (%p890_p3), [#allocation3], 16  }
  0x1b   : > { %838 = vsyncadd (%p890_p3), [#allocation3], 4294967280 }
  0x1c   : > { %210 = sfence }
  0x1d   : > { %s721_s27 = sshll.u32 %s714_s19, 4  ;;  %v728_v0 = vld [vmem:[%s1234_s1] ss:$0 sm:$0xff]  ;;  %vm298_vm0 = vcmask 130048   ;;  %s274_s9 = sld [smem:[#allocation2]]  ;;  %v844_v55 = vmov 1.0  }
  0x1e   : > { %p239_p0 = scmp.lt.s32.totalorder %s721_s27, 31  ;;  %s727_s10 = sld [smem:[#allocation2 + $0x1]]  ;;  %vm595_vm7 = vcmask 7168  }
  0x20   : > { %s1242_s27 = smov (!%p239_p0, %s721_s27), 31 }
  0x21   : > { %s904_s28 = sshll.u32 %s1242_s27, 3 }
  0x22   : > { %s913_s8 = scalar_lea.vmem %s1233_s0, %s904_s28  ;;  %s1052_s15 = scalar_lea.vmem %s1237_s4, %s904_s28 }
  0x23   : > { %v916_v1 = vld [vmem:[%s913_s8 + $0x10] sm:$0xff]  ;;  %v919_v2 = vld [vmem:[%s913_s8] sm:$0xff]  ;;  %v922_v3 = vld [vmem:[%s913_s8 + $0x18] sm:$0xff]  ;;  %v995_v49 = vstv %s274_s9  ;;  %s1058_s19 = scalar_lea.vmem %s1238_s5, %s904_s28 }
  0x24   : > { %v284_v4 = vmul.f32 %v728_v0, %v916_v1  ;;  %v282_v5 = vmul.f32 %v728_v0, %v919_v2  ;;  %v285_v6 = vmul.f32 %v728_v0, %v922_v3  ;;  %v928_v7 = vld [vmem:[%s913_s8 + $0x8] sm:$0xff]  ;;  %v935_v10 = vld [vmem:[%s913_s8 + $0x20] sm:$0xff]  ;;  %v944_v17 = vld [vmem:[%s913_s8 + $0x38] sm:$0xff]  ;;  %v999_v54 = vstv %s727_s10 }
  0x25   : > { %v283_v8 = vmul.f32 %v728_v0, %v928_v7  ;;  %v932_v9 = vld [vmem:[%s913_s8 + $0x28] sm:$0xff]  ;;  %v286_v16 = vmul.f32 %v728_v0, %v935_v10  ;;  %v947_v18 = vld [vmem:[%s913_s8 + $0x30] sm:$0xff]  ;;  %v289_v21 = vmul.f32 %v728_v0, %v944_v17  ;;  %v957_v24 = vld [vmem:[%s913_s8 + $0x40] sm:$0xff] }
  0x26   : > { %v305_v11 = vsel %vm298_vm0, %v284_v4, 0.0  ;;  %v299_v12 = vsel %vm298_vm0, %v282_v5, 0.0  ;;  %v308_v13 = vsel %vm298_vm0, %v285_v6, 0.0  ;;  %v287_v15 = vmul.f32 %v728_v0, %v932_v9  ;;  %v954_v23 = vld [vmem:[%s913_s8 + $0x48] sm:$0xff]  ;;  %v964_v29 = vld [vmem:[%s913_s8 + $0x58] sm:$0xff]  ;;  %v967_v30 = vld [vmem:[%s913_s8 + $0x50] sm:$0xff] }
  0x27   : > { %306 = vadd.xlane.f32.xlu1 %v305_v11  ;;  %300 = vadd.xlane.f32.xlu0 %v299_v12  ;;  %v302_v14 = vsel %vm298_vm0, %v283_v8, 0.0  ;;  %v311_v20 = vsel %vm298_vm0, %v286_v16, 0.0  ;;  %v288_v22 = vmul.f32 %v728_v0, %v947_v18  ;;  %v320_v25 = vsel %vm298_vm0, %v289_v21, 0.0  ;;  %v974_v35 = vld [vmem:[%s913_s8 + $0x68] sm:$0xff]  ;;  %v977_v36 = vld [vmem:[%s913_s8 + $0x60] sm:$0xff]  ;;  %v984_v41 = vld [vmem:[%s913_s8 + $0x78] sm:$0xff] }
  0x28   : > { %v314_v19 = vsel %vm298_vm0, %v287_v15, 0.0  ;;  %v291_v27 = vmul.f32 %v728_v0, %v954_v23  ;;  %v290_v28 = vmul.f32 %v728_v0, %v957_v24  ;;  %v293_v33 = vmul.f32 %v728_v0, %v964_v29  ;;  %v987_v42 = vld [vmem:[%s913_s8 + $0x70] sm:$0xff] }
  0x29   : > { %v317_v26 = vsel %vm298_vm0, %v288_v22, 0.0  ;;  %v292_v34 = vmul.f32 %v728_v0, %v967_v30  ;;  %v295_v39 = vmul.f32 %v728_v0, %v974_v35  ;;  %v294_v40 = vmul.f32 %v728_v0, %v977_v36 }
  0x2a   : > { %v326_v31 = vsel %vm298_vm0, %v291_v27, 0.0  ;;  %v323_v32 = vsel %vm298_vm0, %v290_v28, 0.0  ;;  %v332_v37 = vsel %vm298_vm0, %v293_v33, 0.0  ;;  %v297_v45 = vmul.f32 %v728_v0, %v984_v41 }
  0x2b   : > { %309 = vadd.xlane.f32.xlu1 %v308_v13  ;;  %303 = vadd.xlane.f32.xlu0 %v302_v14  ;;  %v329_v38 = vsel %vm298_vm0, %v292_v34, 0.0  ;;  %v338_v43 = vsel %vm298_vm0, %v295_v39, 0.0  ;;  %v335_v44 = vsel %vm298_vm0, %v294_v40, 0.0  ;;  %v296_v46 = vmul.f32 %v728_v0, %v987_v42 }
  0x2c   : > { %v344_v47 = vsel %vm298_vm0, %v297_v45, 0.0 }
  0x2d   : > { %v341_v48 = vsel %vm298_vm0, %v296_v46, 0.0 }
  0x2f   : > { %315 = vadd.xlane.f32.xlu1 %v314_v19  ;;  %312 = vadd.xlane.f32.xlu0 %v311_v20 }
  0x33   : > { %321 = vadd.xlane.f32.xlu1 %v320_v25  ;;  %318 = vadd.xlane.f32.xlu0 %v317_v26 }
  0x37   : > { %327 = vadd.xlane.f32.xlu1 %v326_v31  ;;  %324 = vadd.xlane.f32.xlu0 %v323_v32 }
  0x3b   : > { %333 = vadd.xlane.f32.xlu1 %v332_v37  ;;  %330 = vadd.xlane.f32.xlu0 %v329_v38 }
  0x3f   : > { %339 = vadd.xlane.f32.xlu1 %v338_v43  ;;  %336 = vadd.xlane.f32.xlu0 %v335_v44 }
  0x43   : > { %345 = vadd.xlane.f32.xlu1 %v344_v47  ;;  %342 = vadd.xlane.f32.xlu0 %v341_v48 }
  0xb4   : > { %v307_v50 = vpop.xlane.xlu1 %306  ;;  %v301_v51 = vpop.xlane.xlu0 %300 }
  0xb5   : > { %v350_v52 = vadd.f32 %v995_v49, %v307_v50  ;;  %v348_v53 = vadd.f32 %v995_v49, %v301_v51 }
  0xb7   : > { %vm366_vm1 = vcmp.lt.f32.partialorder %v350_v52, 0.0  ;;  %vm364_vm2 = vcmp.lt.f32.partialorder %v348_v53, 0.0 }
  0xb8   : > { %v382_v56 = vsel %vm366_vm1, 0.1, %v844_v55  ;;  %v380_v57 = vsel %vm364_vm2, 0.1, %v844_v55  ;;  %v310_v58 = vpop.xlane.xlu1 %309  ;;  %v304_v59 = vpop.xlane.xlu0 %303 }
  0xb9   : > { %v399_v60 = vmul.f32 %v999_v54, %v382_v56  ;;  %v397_v61 = vmul.f32 %v999_v54, %v380_v57  ;;  %v351_v62 = vadd.f32 %v995_v49, %v310_v58  ;;  %v349_v63 = vadd.f32 %v995_v49, %v304_v59 }
  0xba   : > { %v447_v15 = vmul.f32 %v382_v56, %v350_v52  ;;  %v445_v20 = vmul.f32 %v380_v57, %v348_v53  ;;  %v1036_v53 = vld [vmem:[%s1235_s2] ss:$0 sm:$0xff] }
  0xbb   : > { %v415_v0 = vadd.f32 1.0, %v399_v60  ;;  %v413_v4 = vadd.f32 1.0, %v397_v61  ;;  %vm367_vm3 = vcmp.lt.f32.partialorder %v351_v62, 0.0  ;;  %vm365_vm4 = vcmp.lt.f32.partialorder %v349_v63, 0.0 }
  0xbc   : > { %v316_v5 = vpop.xlane.xlu1 %315  ;;  %v313_v6 = vpop.xlane.xlu0 %312  ;;  %v383_v12 = vsel %vm367_vm3, 0.1, %v844_v55  ;;  %v381_v14 = vsel %vm365_vm4, 0.1, %v844_v55 }
  0xbd   : > { %752 = vrcp.f32 %v415_v0  ;;  %v533_v8 = vand.u32 2147483647, %v415_v0  ;;  %v531_v11 = vand.u32 2147483647, %v413_v4  ;;  %v400_v13 = vmul.f32 %v999_v54, %v383_v12 }
  0xbe   : > { %754 = vrcp.f32 %v413_v4  ;;  %v398_v16 = vmul.f32 %v999_v54, %v381_v14  ;;  %v353_v19 = vadd.f32 %v995_v49, %v316_v5  ;;  %v352_v22 = vadd.f32 %v995_v49, %v313_v6 }
  0xbf   : > { %756 = vlog2.f32 %v533_v8  ;;  %v416_v21 = vadd.f32 1.0, %v400_v13  ;;  %v448_v34 = vmul.f32 %v383_v12, %v351_v62  ;;  %v446_v40 = vmul.f32 %v381_v14, %v349_v63 }
  0xc0   : > { %758 = vlog2.f32 %v531_v11  ;;  %v322_v25 = vpop.xlane.xlu1 %321  ;;  %v319_v26 = vpop.xlane.xlu0 %318  ;;  %v414_v27 = vadd.f32 1.0, %v398_v16  ;;  %vm369_vm5 = vcmp.lt.f32.partialorder %v353_v19, 0.0  ;;  %vm368_vm6 = vcmp.lt.f32.partialorder %v352_v22, 0.0 }
  0xc1   : > { %v1014_v28 = vadd.f32 %v995_v49, %v322_v25  ;;  %v1017_v31 = vadd.f32 %v995_v49, %v319_v26  ;;  %760 = vrcp.f32 %v416_v21  ;;  %v534_v32 = vand.u32 2147483647, %v416_v21 }
  0xc2   : > { %v385_v33 = vsel %vm369_vm5, 0.1, %v844_v55  ;;  %762 = vrcp.f32 %v414_v27  ;;  %v532_v37 = vand.u32 2147483647, %v414_v27  ;;  %v384_v39 = vsel %vm368_vm6, 0.1, %v844_v55 }
  0xc3   : > { %v402_v38 = vmul.f32 %v999_v54, %v385_v33  ;;  %764 = vlog2.f32 %v534_v32  ;;  %vm371_vm8 = vcmp.lt.f32.partialorder %v1014_v28, 0.0  ;;  %vm370_vm9 = vcmp.lt.f32.partialorder %v1017_v31, 0.0 }
  0xc4   : > { %766 = vlog2.f32 %v532_v37  ;;  %v401_v44 = vmul.f32 %v999_v54, %v384_v39  ;;  %v328_v45 = vpop.xlane.xlu1 %327  ;;  %v325_v46 = vpop.xlane.xlu0 %324  ;;  %v1025_v47 = vmul.f32 %v385_v33, %v353_v19  ;;  %v1027_v48 = vmul.f32 %v384_v39, %v352_v22 }
  0xc5   : > { %v418_v43 = vadd.f32 1.0, %v402_v38  ;;  %v387_v50 = vsel %vm371_vm8, 0.1, %v844_v55  ;;  %v1031_v51 = vsel %vm370_vm9, 0.1, %v844_v55  ;;  %v1042_v62 = vadd.f32 %v995_v49, %v328_v45 }
  0xc6   : > { %v417_v57 = vadd.f32 1.0, %v401_v44  ;;  %v404_v58 = vmul.f32 %v999_v54, %v387_v50  ;;  %v403_v61 = vmul.f32 %v999_v54, %v1031_v51  ;;  %v1045_v63 = vadd.f32 %v995_v49, %v325_v46 }
  0xc7   : > { %v753_v52 = vpop.eup %752  ;;  %768 = vrcp.f32 %v418_v43  ;;  %v536_v56 = vand.u32 2147483647, %v418_v43  ;;  %vm373_vm10 = vcmp.lt.f32.partialorder %v1042_v62, 0.0  ;;  %v452_v45 = vmul.f32 %v387_v50, %v1014_v28 }
  0xc8   : > { %v755_v59 = vpop.eup %754  ;;  %v463_v60 = vmul.f32 %v753_v52, %v447_v15  ;;  %v535_v5 = vand.u32 2147483647, %v417_v57  ;;  %v420_v6 = vadd.f32 1.0, %v404_v58  ;;  %v419_v13 = vadd.f32 1.0, %v403_v61 }
  0xc9   : > { %v757_v0 = vpop.eup %756  ;;  %v461_v4 = vmul.f32 %v755_v59, %v445_v20  ;;  %770 = vlog2.f32 %v536_v56  ;;  %vm372_vm11 = vcmp.lt.f32.partialorder %v1045_v63, 0.0  ;;  %v1075_v39 = vsel %vm373_vm10, 0.1, %v844_v55 }
  0xca   : > { %v759_v8 = vpop.eup %758  ;;  %v485_v11 = vmul.f32 %v1036_v53, %v463_v60  ;;  %v552_v12 = vmul.f32 0.6931472, %v757_v0  ;;  %772 = vrcp.f32 %v417_v57  ;;  %v538_v16 = vand.u32 2147483647, %v420_v6 }
  0xcb   : > { %v483_v14 = vmul.f32 %v1036_v53, %v461_v4  ;;  %v548_v15 = vmul.f32 0.6931472, %v759_v8  ;;  %774 = vlog2.f32 %v535_v5  ;;  %v761_v19 = vpop.eup %760  ;;  %v537_v22 = vand.u32 2147483647, %v419_v13 }
  0xcc   : > { %v501_v20 = vsub.f32 %v916_v1, %v485_v11  ;;  %v581_v21 = vsub.f32 0.0, %v552_v12  ;;  %776 = vrcp.f32 %v420_v6  ;;  %v763_v25 = vpop.eup %762  ;;  %v464_v32 = vmul.f32 %v761_v19, %v448_v34  ;;  %v334_v1 = vpop.xlane.xlu1 %333 }
  0xcd   : > { %v499_v26 = vsub.f32 %v919_v2, %v483_v14  ;;  %v579_v27 = vsub.f32 0.0, %v548_v15  ;;  %778 = vlog2.f32 %v538_v16  ;;  %v765_v33 = vpop.eup %764  ;;  %v462_v37 = vmul.f32 %v763_v25, %v446_v40  ;;  %v331_v40 = vpop.xlane.xlu0 %330 }
  0xce   : > { %517 = vst.msk [vmem:[%s1052_s15 + $0x10] sm:$0xff] %vm298_vm0, %v501_v20  ;;  %780 = vrcp.f32 %v419_v13  ;;  %v767_v38 = vpop.eup %766  ;;  %v486_v2 = vmul.f32 %v1036_v53, %v464_v32  ;;  %v554_v34 = vmul.f32 0.6931472, %v765_v33  ;;  %v406_v46 = vmul.f32 %v999_v54, %v1075_v39 }
  0xcf   : > { %598 = vst.msk [vmem:[%s1058_s19 + $0x10] sm:$0xff] %vm595_vm7, %v581_v21  ;;  %596 = vst.msk [vmem:[%s1058_s19] sm:$0xff] %vm595_vm7, %v579_v27  ;;  %782 = vlog2.f32 %v537_v22  ;;  %v484_v43 = vmul.f32 %v1036_v53, %v462_v37  ;;  %v550_v44 = vmul.f32 0.6931472, %v767_v38  ;;  %v1085_v58 = vsel %vm372_vm11, 0.1, %v844_v55 }
  0xd0   : > { %515 = vst.msk [vmem:[%s1052_s15] sm:$0xff] %vm298_vm0, %v499_v26  ;;  %v502_v56 = vsub.f32 %v922_v3, %v486_v2  ;;  %v582_v57 = vsub.f32 0.0, %v554_v34  ;;  %v1088_v59 = vadd.f32 %v995_v49, %v334_v1  ;;  %v422_v61 = vadd.f32 1.0, %v406_v46  ;;  %v340_v11 = vpop.xlane.xlu1 %339 }
  0xd1   : > { %v769_v52 = vpop.eup %768  ;;  %v500_v60 = vsub.f32 %v928_v7, %v484_v43  ;;  %v580_v28 = vsub.f32 0.0, %v550_v44  ;;  %v451_v3 = vmul.f32 %v1031_v51, %v1017_v31  ;;  %v405_v4 = vmul.f32 %v999_v54, %v1085_v58  ;;  %v337_v14 = vpop.xlane.xlu0 %336 }
  0xd2   : > { %v466_v50 = vmul.f32 %v769_v52, %v1025_v47  ;;  %518 = vst.msk [vmem:[%s1052_s15 + $0x18] sm:$0xff] %vm298_vm0, %v502_v56  ;;  %vm375_vm12 = vcmp.lt.f32.partialorder %v1088_v59, 0.0  ;;  %v1102_v5 = vadd.f32 %v995_v49, %v331_v40  ;;  %784 = vrcp.f32 %v422_v61 }
  0xd3   : > { %v771_v0 = vpop.eup %770  ;;  %599 = vst.msk [vmem:[%s1058_s19 + $0x18] sm:$0xff] %vm595_vm7, %v582_v57  ;;  %597 = vst.msk [vmem:[%s1058_s19 + $0x8] sm:$0xff] %vm595_vm7, %v580_v28  ;;  %v540_v8 = vand.u32 2147483647, %v422_v61  ;;  %v421_v12 = vadd.f32 1.0, %v405_v4  ;;  %v454_v46 = vmul.f32 %v1075_v39, %v1042_v62  ;;  %v1142_v28 = vadd.f32 %v995_v49, %v340_v11 }
  0xd4   : > { %v773_v7 = vpop.eup %772  ;;  %516 = vst.msk [vmem:[%s1052_s15 + $0x8] sm:$0xff] %vm298_vm0, %v500_v60  ;;  %v488_v47 = vmul.f32 %v1036_v53, %v466_v50  ;;  %v558_v6 = vmul.f32 0.6931472, %v771_v0  ;;  %v1111_v13 = vsel %vm375_vm12, 0.1, %v844_v55  ;;  %vm374_vm13 = vcmp.lt.f32.partialorder %v1102_v5, 0.0  ;;  %v346_v44 = vpop.xlane.xlu1 %345 }
  0xd5   : > { %v775_v31 = vpop.eup %774  ;;  %v465_v51 = vmul.f32 %v773_v7, %v1027_v48  ;;  %786 = vlog2.f32 %v540_v8  ;;  %v539_v25 = vand.u32 2147483647, %v421_v12  ;;  %v1129_v43 = vsel %vm374_vm13, 0.1, %v844_v55  ;;  %v343_v56 = vpop.xlane.xlu0 %342 }
  0xd6   : > { %v777_v15 = vpop.eup %776  ;;  %v504_v16 = vsub.f32 %v932_v9, %v488_v47  ;;  %v584_v19 = vsub.f32 0.0, %v558_v6  ;;  %v556_v20 = vmul.f32 0.6931472, %v775_v31  ;;  %788 = vrcp.f32 %v421_v12 }
  0xd7   : > { %v779_v21 = vpop.eup %778  ;;  %v487_v22 = vmul.f32 %v1036_v53, %v465_v51  ;;  %v468_v48 = vmul.f32 %v777_v15, %v452_v45  ;;  %v408_v9 = vmul.f32 %v999_v54, %v1111_v13  ;;  %790 = vlog2.f32 %v539_v25 }
  0xd8   : > { %v781_v26 = vpop.eup %780  ;;  %520 = vst.msk [vmem:[%s1052_s15 + $0x28] sm:$0xff] %vm298_vm0, %v504_v16  ;;  %v583_v27 = vsub.f32 0.0, %v556_v20  ;;  %v562_v32 = vmul.f32 0.6931472, %v779_v21  ;;  %v407_v52 = vmul.f32 %v999_v54, %v1129_v43  ;;  %v1148_v62 = vadd.f32 %v995_v49, %v337_v14 }
  0xd9   : > { %601 = vst.msk [vmem:[%s1058_s19 + $0x28] sm:$0xff] %vm595_vm7, %v584_v19  ;;  %v783_v33 = vpop.eup %782  ;;  %v503_v37 = vsub.f32 %v935_v10, %v487_v22  ;;  %v490_v1 = vmul.f32 %v1036_v53, %v468_v48  ;;  %v467_v38 = vmul.f32 %v781_v26, %v451_v3  ;;  %v424_v40 = vadd.f32 1.0, %v408_v9 }
  0xda   : > { %600 = vst.msk [vmem:[%s1058_s19 + $0x20] sm:$0xff] %vm595_vm7, %v583_v27  ;;  %v586_v2 = vsub.f32 0.0, %v562_v32  ;;  %v560_v34 = vmul.f32 0.6931472, %v783_v33  ;;  %v423_v50 = vadd.f32 1.0, %v407_v52  ;;  %v1151_v39 = vadd.f32 %v995_v49, %v346_v44 }
  0xdb   : > { %519 = vst.msk [vmem:[%s1052_s15 + $0x20] sm:$0xff] %vm298_vm0, %v503_v37  ;;  %v506_v10 = vsub.f32 %v944_v17, %v490_v1  ;;  %v489_v45 = vmul.f32 %v1036_v53, %v467_v38  ;;  %792 = vrcp.f32 %v424_v40  ;;  %v542_v60 = vand.u32 2147483647, %v424_v40 }
  0xdc   : > { %603 = vst.msk [vmem:[%s1058_s19 + $0x38] sm:$0xff] %vm595_vm7, %v586_v2  ;;  %v585_v57 = vsub.f32 0.0, %v560_v34  ;;  %v785_v61 = vpop.eup %784  ;;  %vm377_vm14 = vcmp.lt.f32.partialorder %v1142_v28, 0.0  ;;  %v1157_v0 = vadd.f32 %v995_v49, %v343_v56  ;;  %v453_v47 = vmul.f32 %v1085_v58, %v1045_v63 }
  0xdd   : > { %522 = vst.msk [vmem:[%s1052_s15 + $0x38] sm:$0xff] %vm298_vm0, %v506_v10  ;;  %v505_v17 = vsub.f32 %v947_v18, %v489_v45  ;;  %794 = vlog2.f32 %v542_v60  ;;  %v470_v3 = vmul.f32 %v785_v61, %v454_v46  ;;  %v541_v18 = vand.u32 2147483647, %v423_v50 }
  0xde   : > { %602 = vst.msk [vmem:[%s1058_s19 + $0x30] sm:$0xff] %vm595_vm7, %v585_v57  ;;  %796 = vrcp.f32 %v423_v50  ;;  %v393_v4 = vsel %vm377_vm14, 0.1, %v844_v55  ;;  %vm376_vm15 = vcmp.lt.f32.partialorder %v1148_v62, 0.0  ;;  %vm379_vm1 = vcmp.lt.f32.partialorder %v1151_v39, 0.0 }
  0xdf   : > { %521 = vst.msk [vmem:[%s1052_s15 + $0x30] sm:$0xff] %vm298_vm0, %v505_v17  ;;  %v787_v7 = vpop.eup %786  ;;  %v410_v6 = vmul.f32 %v999_v54, %v393_v4  ;;  %v492_v49 = vmul.f32 %v1036_v53, %v470_v3  ;;  %798 = vlog2.f32 %v541_v18  ;;  %v392_v31 = vsel %vm376_vm15, 0.1, %v844_v55 }
  0xe0   : > { %v789_v8 = vpop.eup %788  ;;  %v566_v11 = vmul.f32 0.6931472, %v787_v7  ;;  %v409_v14 = vmul.f32 %v999_v54, %v392_v31  ;;  %v395_v16 = vsel %vm379_vm1, 0.1, %v844_v55  ;;  %vm378_vm2 = vcmp.lt.f32.partialorder %v1157_v0, 0.0 }
  0xe1   : > { %v469_v51 = vmul.f32 %v789_v8, %v453_v47  ;;  %v426_v12 = vadd.f32 1.0, %v410_v6  ;;  %v791_v63 = vpop.eup %790  ;;  %v508_v58 = vsub.f32 %v954_v23, %v492_v49  ;;  %v456_v22 = vmul.f32 %v1111_v13, %v1088_v59 }
  0xe2   : > { %v588_v15 = vsub.f32 0.0, %v566_v11  ;;  %v564_v20 = vmul.f32 0.6931472, %v791_v63  ;;  %v425_v23 = vadd.f32 1.0, %v409_v14  ;;  %v412_v48 = vmul.f32 %v999_v54, %v395_v16 }
  0xe3   : > { %v491_v19 = vmul.f32 %v1036_v53, %v469_v51  ;;  %800 = vrcp.f32 %v426_v12  ;;  %v544_v21 = vand.u32 2147483647, %v426_v12  ;;  %524 = vst.msk [vmem:[%s1052_s15 + $0x48] sm:$0xff] %vm298_vm0, %v508_v58  ;;  %v394_v25 = vsel %vm378_vm2, 0.1, %v844_v55 }
  0xe4   : > { %605 = vst.msk [vmem:[%s1058_s19 + $0x48] sm:$0xff] %vm595_vm7, %v588_v15  ;;  %v587_v32 = vsub.f32 0.0, %v564_v20  ;;  %v411_v9 = vmul.f32 %v999_v54, %v394_v25  ;;  %v543_v37 = vand.u32 2147483647, %v425_v23  ;;  %v428_v1 = vadd.f32 1.0, %v412_v48 }
  0xe5   : > { %v793_v26 = vpop.eup %792  ;;  %v507_v27 = vsub.f32 %v957_v24, %v491_v19  ;;  %802 = vlog2.f32 %v544_v21  ;;  %v455_v59 = vmul.f32 %v1129_v43, %v1102_v5  ;;  %v458_v46 = vmul.f32 %v393_v4, %v1142_v28 }
  0xe6   : > { %v472_v33 = vmul.f32 %v793_v26, %v456_v22  ;;  %804 = vrcp.f32 %v425_v23  ;;  %604 = vst.msk [vmem:[%s1058_s19 + $0x40] sm:$0xff] %vm595_vm7, %v587_v32  ;;  %v427_v55 = vadd.f32 1.0, %v411_v9  ;;  %v546_v54 = vand.u32 2147483647, %v428_v1 }
  0xe7   : > { %v795_v38 = vpop.eup %794  ;;  %523 = vst.msk [vmem:[%s1052_s15 + $0x40] sm:$0xff] %vm298_vm0, %v507_v27  ;;  %806 = vlog2.f32 %v543_v37  ;;  %v457_v17 = vmul.f32 %v392_v31, %v1148_v62  ;;  %v460_v7 = vmul.f32 %v395_v16, %v1151_v39  ;;  %v459_v11 = vmul.f32 %v394_v25, %v1157_v0 }
  0xe8   : > { %v797_v13 = vpop.eup %796  ;;  %v494_v24 = vmul.f32 %v1036_v53, %v472_v33  ;;  %v570_v2 = vmul.f32 0.6931472, %v795_v38  ;;  %808 = vrcp.f32 %v428_v1  ;;  %v545_v40 = vand.u32 2147483647, %v427_v55 }
  0xe9   : > { %v471_v34 = vmul.f32 %v797_v13, %v455_v59  ;;  %v799_v44 = vpop.eup %798  ;;  %810 = vlog2.f32 %v546_v54 }
  0xea   : > { %v510_v10 = vsub.f32 %v964_v29, %v494_v24  ;;  %v590_v45 = vsub.f32 0.0, %v570_v2  ;;  %v568_v43 = vmul.f32 0.6931472, %v799_v44  ;;  %812 = vrcp.f32 %v427_v55 }
  0xeb   : > { %v493_v5 = vmul.f32 %v1036_v53, %v471_v34  ;;  %814 = vlog2.f32 %v545_v40 }
  0xec   : > { %526 = vst.msk [vmem:[%s1052_s15 + $0x58] sm:$0xff] %vm298_vm0, %v510_v10  ;;  %v589_v57 = vsub.f32 0.0, %v568_v43 }
  0xed   : > { %607 = vst.msk [vmem:[%s1058_s19 + $0x58] sm:$0xff] %vm595_vm7, %v590_v45  ;;  %v801_v52 = vpop.eup %800  ;;  %v509_v56 = vsub.f32 %v967_v30, %v493_v5 }
  0xee   : > { %v474_v60 = vmul.f32 %v801_v52, %v458_v46  ;;  %606 = vst.msk [vmem:[%s1058_s19 + $0x50] sm:$0xff] %vm595_vm7, %v589_v57 }
  0xef   : > { %v803_v29 = vpop.eup %802  ;;  %525 = vst.msk [vmem:[%s1052_s15 + $0x50] sm:$0xff] %vm298_vm0, %v509_v56 }
  0xf0   : > { %v805_v50 = vpop.eup %804  ;;  %v496_v61 = vmul.f32 %v1036_v53, %v474_v60  ;;  %v574_v3 = vmul.f32 0.6931472, %v803_v29 }
  0xf1   : > { %v473_v28 = vmul.f32 %v805_v50, %v457_v17  ;;  %v807_v18 = vpop.eup %806 }
  0xf2   : > { %v512_v4 = vsub.f32 %v974_v35, %v496_v61  ;;  %v592_v30 = vsub.f32 0.0, %v574_v3  ;;  %v809_v47 = vpop.eup %808  ;;  %v572_v8 = vmul.f32 0.6931472, %v807_v18 }
  0xf3   : > { %v495_v6 = vmul.f32 %v1036_v53, %v473_v28  ;;  %v811_v49 = vpop.eup %810  ;;  %v476_v62 = vmul.f32 %v809_v47, %v460_v7 }
  0xf4   : > { %528 = vst.msk [vmem:[%s1052_s15 + $0x68] sm:$0xff] %vm298_vm0, %v512_v4  ;;  %v813_v35 = vpop.eup %812  ;;  %v591_v39 = vsub.f32 0.0, %v572_v8  ;;  %v578_v51 = vmul.f32 0.6931472, %v811_v49 }
  0xf5   : > { %609 = vst.msk [vmem:[%s1058_s19 + $0x68] sm:$0xff] %vm595_vm7, %v592_v30  ;;  %v511_v31 = vsub.f32 %v977_v36, %v495_v6  ;;  %v815_v12 = vpop.eup %814  ;;  %v498_v14 = vmul.f32 %v1036_v53, %v476_v62  ;;  %v475_v63 = vmul.f32 %v813_v35, %v459_v11 }
  0xf6   : > { %608 = vst.msk [vmem:[%s1058_s19 + $0x60] sm:$0xff] %vm595_vm7, %v591_v39  ;;  %v594_v58 = vsub.f32 0.0, %v578_v51  ;;  %v576_v15 = vmul.f32 0.6931472, %v815_v12 }
  0xf7   : > { %527 = vst.msk [vmem:[%s1052_s15 + $0x60] sm:$0xff] %vm298_vm0, %v511_v31  ;;  %v514_v0 = vsub.f32 %v984_v41, %v498_v14  ;;  %v497_v16 = vmul.f32 %v1036_v53, %v475_v63 }
  0xf8   : > { %611 = vst.msk [vmem:[%s1058_s19 + $0x78] sm:$0xff] %vm595_vm7, %v594_v58  ;;  %v593_v36 = vsub.f32 0.0, %v576_v15 }
  0xf9   : > { %530 = vst.msk [vmem:[%s1052_s15 + $0x78] sm:$0xff] %vm298_vm0, %v514_v0  ;;  %v513_v19 = vsub.f32 %v987_v42, %v497_v16 }
  0xfa   : > { %610 = vst.msk [vmem:[%s1058_s19 + $0x70] sm:$0xff] %vm595_vm7, %v593_v36 }
  0xfb   : > { %529 = vst.msk [vmem:[%s1052_s15 + $0x70] sm:$0xff] %vm298_vm0, %v513_v19 }
  0xfc PF: > { %s17_s18 = sadd.s32 1, %s841_s18  }
  0xfd   : > { %p14_p1 = scmp.ge.s32.totalorder %s17_s18, 4  }
  0xff   :  { %16 = sbr.rel (!%p14_p1) target bundleno = 1 (0x1), region = 83 }
 0x106   :  { %651 = vsyncpa [#allocation3], 1 }
 0x107   :  { %653 = vsyncpa [#allocation3 + $0x1], 1 }

</bundles_post_ra>
